<compile_context>
chip_gen: v7x
topology: tpu7x:2x2x1
jax: 0.10.0
libtpu: 0.0.40
codegen_flags: <defaults>
</compile_context>

<pallas_src>
import math

import jax
import jax.numpy as jnp
from jax.experimental import pallas as pl
from jax.experimental.pallas import tpu as pltpu

ENTITY_TYPES = {'PERSON': 1, 'PROFESSION': 2, 'ORGANIZATION': 3, 'FAMILY': 4, 'LOCATION': 5}
NUM_NER_LABELS = len(ENTITY_TYPES) * 2 + 1          # 11
MLP_HIDDEN = 256                                    # ner_classifier hidden dim
PAD_LABELS = 128                                    # lane-dense padded output width


def ner_mlp_kernel(x_ref, w1_ref, b1_ref, w2_ref, b2_ref, o_ref):
    """Fused ner_classifier: relu(x @ W1 + b1) @ W2 + b2 for one row tile.

    Matmuls run on the bf16 MXU path with f32 accumulation; bias + ReLU stay
    in f32 on the VPU (v5e has no bf16 VPU). Dropout(0.3) is identity at eval.
    """
    x = x_ref[...]                                                     # (tm, H)  bf16
    h = jnp.dot(x, w1_ref[...], preferred_element_type=jnp.float32)    # (tm, 256) f32
    h = jnp.maximum(h + b1_ref[...], 0.0)                              # bias + ReLU in f32
    o = jnp.dot(h.astype(jnp.bfloat16), w2_ref[...],
                preferred_element_type=jnp.float32)                    # (tm, 128) f32
    o_ref[...] = (o + b2_ref[...]).astype(o_ref.dtype)                 # bf16 writeback


def _round_up(x, m):
    return ((x + m - 1) // m) * m


def _pick_row_tile(m, tm_max=512):
    """Size-aware row tile: big tiles for large M, one block for tiny inputs,
    and at least 2 grid steps when there is enough work (v7x has 2 TCs)."""
    tm = min(tm_max, _round_up(m, 8))
    if m >= 512 and pl.cdiv(m, tm) < 2:
        tm = _round_up(pl.cdiv(m, 2), 8)
    return tm


def ner_classifier_pallas(sequence_output, w1_bf16, b1, w2p_bf16, b2p, *, tm=None):
    """sequence_output: [B, S, H] float -> ner_logits [B, S, NUM_NER_LABELS] f32."""
    B, S, H = sequence_output.shape
    M = B * S
    x = sequence_output.reshape(M, H).astype(jnp.bfloat16)   # halve HBM traffic of x

    if tm is None:
        tm = _pick_row_tile(M)
    grid = (pl.cdiv(M, tm),)          # no jnp.pad: partial last block handled by Pallas

    out = pl.pallas_call(
        ner_mlp_kernel,
        out_shape=jax.ShapeDtypeStruct((M, PAD_LABELS), jnp.bfloat16),
        grid_spec=pltpu.PrefetchScalarGridSpec(
            num_scalar_prefetch=0,
            grid=grid,
            in_specs=[
                pl.BlockSpec((tm, H), lambda i: (i, 0)),                   # x row tile
                pl.BlockSpec((H, MLP_HIDDEN), lambda i: (0, 0)),           # W1 (grid-invariant)
                pl.BlockSpec((1, MLP_HIDDEN), lambda i: (0, 0)),           # b1
                pl.BlockSpec((MLP_HIDDEN, PAD_LABELS), lambda i: (0, 0)),  # W2 (lane-padded)
                pl.BlockSpec((1, PAD_LABELS), lambda i: (0, 0)),           # b2 (lane-padded)
            ],
            out_specs=pl.BlockSpec((tm, PAD_LABELS), lambda i: (i, 0)),
        ),
        compiler_params=pltpu.CompilerParams(
            dimension_semantics=("parallel",),
        ),
    )(x, w1_bf16, b1, w2p_bf16, b2p)

    # Only 11 of the 128 lanes are real labels; rows are exact (no padding).
    logits = out[:, :NUM_NER_LABELS].astype(jnp.float32).reshape(B, S, NUM_NER_LABELS)
    return logits


def xavier_uniform(key, fan_in, fan_out, dtype=jnp.float32):
    limit = math.sqrt(6.0 / (fan_in + fan_out))
    return jax.random.uniform(key, (fan_in, fan_out), minval=-limit, maxval=limit, dtype=dtype)


def init_params(key, hidden_size):
    """Deterministic init matching nn.init.xavier_uniform_ / zero bias."""
    k1, k2 = jax.random.split(key)
    w1 = xavier_uniform(k1, hidden_size, MLP_HIDDEN)            # Linear(H, 256)
    b1 = jnp.zeros((1, MLP_HIDDEN), jnp.float32)
    w2 = xavier_uniform(k2, MLP_HIDDEN, NUM_NER_LABELS)         # Linear(256, 11)
    b2 = jnp.zeros((NUM_NER_LABELS,), jnp.float32)
    # Lane-dense padding of the final projection to 128 output columns.
    w2p = jnp.zeros((MLP_HIDDEN, PAD_LABELS), jnp.float32).at[:, :NUM_NER_LABELS].set(w2)
    b2p = jnp.zeros((1, PAD_LABELS), jnp.float32).at[0, :NUM_NER_LABELS].set(b2)
    # bf16 copies for the MXU operands (biases stay f32).
    w1_bf16 = w1.astype(jnp.bfloat16)
    w2p_bf16 = w2p.astype(jnp.bfloat16)
    return w1, b1, w2, b2, w2p, b2p, w1_bf16, w2p_bf16


if __name__ == "__main__":
    key = jax.random.PRNGKey(0)
    k_seq, k_par = jax.random.split(key)

    # Small shapes consistent with the module: batch=2, seq=16, hidden=128
    # (BERT hidden stand-in; kernel is H-generic).
    B, S, H = 2, 16, 128
    sequence_output = jax.random.normal(k_seq, (B, S, H), dtype=jnp.float32)

    w1, b1, w2, b2, w2p, b2p, w1_bf16, w2p_bf16 = init_params(k_par, H)

    ner_logits = ner_classifier_pallas(sequence_output, w1_bf16, b1, w2p_bf16, b2p)
    ner_logits = jax.block_until_ready(ner_logits)

    # Pure-JAX reference of the same eval-mode forward with matching bf16 casts.
    x2d = sequence_output.reshape(B * S, H).astype(jnp.bfloat16).astype(jnp.float32)
    w1f = w1_bf16.astype(jnp.float32)
    w2f = w2p_bf16[:, :NUM_NER_LABELS].astype(jnp.float32)
    h_ref = jnp.maximum(x2d @ w1f + b1[0], 0.0).astype(jnp.bfloat16).astype(jnp.float32)
    ref = (h_ref @ w2f + b2).reshape(B, S, NUM_NER_LABELS)

    assert ner_logits.shape == (B, S, NUM_NER_LABELS)
    # bf16 output quantization + bf16 operands -> loose tolerance.
    assert jnp.allclose(ner_logits, ref, atol=3e-2, rtol=3e-2), "mismatch vs reference"

    print("KERNEL_OK")
</pallas_src>

<mosaic_0001>
module attributes {stable_mosaic.version = 11 : i64} {
  func.func @ner_mlp_kernel(%arg0: i32, %arg1: memref<32x128xbf16, #tpu.memory_space<vmem>>, %arg2: memref<128x256xbf16, #tpu.memory_space<vmem>>, %arg3: memref<1x256xf32, #tpu.memory_space<vmem>>, %arg4: memref<256x128xbf16, #tpu.memory_space<vmem>>, %arg5: memref<1x128xf32, #tpu.memory_space<vmem>>, %arg6: memref<32x128xbf16, #tpu.memory_space<vmem>>) attributes {dimension_semantics = [#tpu.dimension_semantics<parallel>], iteration_bounds = array<i64: 1>, scalar_prefetch = 0 : i64, scratch_operands = 0 : i64, tpu.core_type = #tpu.core_type<tc>, window_params = [{transform_indices = @transform_0, window_bounds = array<i64: 32, 128>}, {pipeline_mode = #tpu.pipeline_mode<synchronous>, transform_indices = @transform_1, window_bounds = array<i64: 128, 256>}, {pipeline_mode = #tpu.pipeline_mode<synchronous>, transform_indices = @transform_2, window_bounds = array<i64: 1, 256>}, {pipeline_mode = #tpu.pipeline_mode<synchronous>, transform_indices = @transform_3, window_bounds = array<i64: 256, 128>}, {pipeline_mode = #tpu.pipeline_mode<synchronous>, transform_indices = @transform_4, window_bounds = array<i64: 1, 128>}, {transform_indices = @transform_5, window_bounds = array<i64: 32, 128>}]} {
    %c0 = arith.constant 0 : index
    %c0_0 = arith.constant 0 : index
    %0 = vector.load %arg1[%c0, %c0_0] : memref<32x128xbf16, #tpu.memory_space<vmem>>, vector<32x128xbf16>
    %c0_1 = arith.constant 0 : index
    %c0_2 = arith.constant 0 : index
    %1 = vector.load %arg2[%c0_1, %c0_2] : memref<128x256xbf16, #tpu.memory_space<vmem>>, vector<128x256xbf16>
    %cst = arith.constant dense<0.000000e+00> : vector<32x256xf32>
    %2 = tpu.matmul %0, %1, %cst {dimension_numbers = #tpu.dot_dimension_numbers<[1], [0], [0], [1], [0, 0, 1, 1], [], []>} : vector<32x128xbf16>, vector<128x256xbf16>, vector<32x256xf32> -> vector<32x256xf32>
    %c0_3 = arith.constant 0 : index
    %c0_4 = arith.constant 0 : index
    %3 = vector.load %arg3[%c0_3, %c0_4] : memref<1x256xf32, #tpu.memory_space<vmem>>, vector<1x256xf32>
    %4 = vector.broadcast %3 : vector<1x256xf32> to vector<32x256xf32>
    %5 = arith.addf %2, %4 : vector<32x256xf32>
    %cst_5 = arith.constant 0.000000e+00 : f32
    %6 = vector.broadcast %cst_5 : f32 to vector<32x256xf32>
    %7 = arith.maximumf %5, %6 : vector<32x256xf32>
    %8 = arith.truncf %7 : vector<32x256xf32> to vector<32x256xbf16>
    %c0_6 = arith.constant 0 : index
    %c0_7 = arith.constant 0 : index
    %9 = vector.load %arg4[%c0_6, %c0_7] : memref<256x128xbf16, #tpu.memory_space<vmem>>, vector<256x128xbf16>
    %cst_8 = arith.constant dense<0.000000e+00> : vector<32x128xf32>
    %10 = tpu.matmul %8, %9, %cst_8 {dimension_numbers = #tpu.dot_dimension_numbers<[1], [0], [0], [1], [0, 0, 1, 1], [], []>} : vector<32x256xbf16>, vector<256x128xbf16>, vector<32x128xf32> -> vector<32x128xf32>
    %c0_9 = arith.constant 0 : index
    %c0_10 = arith.constant 0 : index
    %11 = vector.load %arg5[%c0_9, %c0_10] : memref<1x128xf32, #tpu.memory_space<vmem>>, vector<1x128xf32>
    %12 = vector.broadcast %11 : vector<1x128xf32> to vector<32x128xf32>
    %13 = arith.addf %10, %12 : vector<32x128xf32>
    %14 = arith.truncf %13 : vector<32x128xf32> to vector<32x128xbf16>
    %c0_11 = arith.constant 0 : index
    %c0_12 = arith.constant 0 : index
    %15 = vector.load %arg6[%c0_11, %c0_12] : memref<32x128xbf16, #tpu.memory_space<vmem>>, vector<32x128xbf16>
    tpu.vector_store %arg6[%c0_11, %c0_12], %14 {strides = array<i32>} : memref<32x128xbf16, #tpu.memory_space<vmem>>, vector<32x128xbf16>,
    return
  }
  func.func @transform_0(%arg0: i32) -> (i32, i32) {
    %c0_i32 = arith.constant 0 : i32
    %c0_i32_0 = arith.constant 0 : i32
    return %arg0, %c0_i32 : i32, i32
  }
  func.func @transform_1(%arg0: i32) -> (i32, i32) {
    %c0_i32 = arith.constant 0 : i32
    %c0_i32_0 = arith.constant 0 : i32
    %c0_i32_1 = arith.constant 0 : i32
    return %c0_i32, %c0_i32_0 : i32, i32
  }
  func.func @transform_2(%arg0: i32) -> (i32, i32) {
    %c0_i32 = arith.constant 0 : i32
    %c0_i32_0 = arith.constant 0 : i32
    %c0_i32_1 = arith.constant 0 : i32
    return %c0_i32, %c0_i32_0 : i32, i32
  }
  func.func @transform_3(%arg0: i32) -> (i32, i32) {
    %c0_i32 = arith.constant 0 : i32
    %c0_i32_0 = arith.constant 0 : i32
    %c0_i32_1 = arith.constant 0 : i32
    return %c0_i32, %c0_i32_0 : i32, i32
  }
  func.func @transform_4(%arg0: i32) -> (i32, i32) {
    %c0_i32 = arith.constant 0 : i32
    %c0_i32_0 = arith.constant 0 : i32
    %c0_i32_1 = arith.constant 0 : i32
    return %c0_i32, %c0_i32_0 : i32, i32
  }
  func.func @transform_5(%arg0: i32) -> (i32, i32) {
    %c0_i32 = arith.constant 0 : i32
    %c0_i32_0 = arith.constant 0 : i32
    return %arg0, %c0_i32 : i32, i32
  }
}

</mosaic_0001>

<bundles_post_ra>
// kernel: tpu_custom_call.1
= control target key start
LH: loop header
LB: loop body
LE: loop exit
PB: predicated region body
PF: predicated region fallthrough
CT: control target
= control target key end

     0   :  { %10 = vsyncpa [#allocation3], 0  ;;  %s803_s0 = inlined_call_operand.hbm [shape: bf16[32,128], index: 0, kind: input, shape index: {}]   ;;  %s804_s1 = inlined_call_operand.hbm [shape: bf16[128,256], index: 1, kind: input, shape index: {}]   ;;  %s805_s2 = inlined_call_operand.vmem [shape: f32[1,256], index: 2, kind: input, shape index: {}]   ;;  %s806_s3 = inlined_call_operand.hbm [shape: bf16[256,128], index: 3, kind: input, shape index: {}]   ;;  %s807_s4 = inlined_call_operand.vmem [shape: f32[1,128], index: 4, kind: input, shape index: {}]   ;;  %s808_s5 = inlined_call_operand.hbm [shape: bf16[32,128], index: 5, kind: output, shape index: {}]  }
   0x1   :  { %11 = vsyncpa [#allocation6], 0 }
   0x2   :  { %12 = vsyncpa [#allocation4], 0  ;;  %s701_s18 = smov [#allocation5]   ;;  %s607_s22 = scalar_lea.hbm %s804_s1, 2048 }
   0x3   :  { %s30_s19 = sshll.u32 %s701_s18, 4  ;;  %p608_p0 = scmp.ne.s32.totalorder %s804_s1, %s607_s22  ;;  %s31_s19 = int_to_ptr.vmem [resolvable:$true] %s30_s19 }
   0x4   :  { %p611_p1 = scmp.lt.u32.totalorder %s607_s22, %s804_s1 }
   0x6   :  { %p613_p2 = pnand %p611_p1, %p608_p0 }
   0x8   :  { %616 = shalt.err (!%p613_p2)
}
   0x9   :  { %s617_s27 = scalar_lea.vmem %s31_s19, 2048  ;;  %p622_p4 = scmp.lt.s32.totalorder %s31_s19, %s31_s19 }
   0xa   :  { %p618_p3 = scmp.ne.s32.totalorder %s31_s19, %s617_s27  ;;  %p623_p5 = scmp.lt.s32.totalorder %s617_s27, %s617_s27 }
   0xc   :  { %p624_p6 = por %p623_p5, %p622_p4 }
   0xe   :  { %p625_p7 = pnand %p624_p6, %p618_p3 }
  0x10   :  { %628 = shalt.err (!%p625_p7)
}
  0x11   :  { %s702_s28 = smov 128   ;;  %s703_s29 = smov 8  }
  0x12   :  { %36 = dma.hbm_to_vmem [thread:$0]  %s804_s1, 2048, %s31_s19, [#allocation6], %s702_s28, %s702_s28, %s703_s29  }
  0x13   :  { %s704_s7 = smov [#allocation2]   ;;  %s629_s11 = scalar_lea.hbm %s803_s0, 256 }
  0x14   :  { %s18_s8 = sshll.u32 %s704_s7, 4  ;;  %p630_p8 = scmp.ne.s32.totalorder %s803_s0, %s629_s11  ;;  %s19_s8 = int_to_ptr.vmem [resolvable:$true] %s18_s8 }
  0x15   :  { %p633_p9 = scmp.lt.u32.totalorder %s629_s11, %s803_s0 }
  0x17   :  { %p635_p10 = pnand %p633_p9, %p630_p8 }
  0x19   :  { %638 = shalt.err (!%p635_p10)
}
  0x1a   :  { %s639_s16 = scalar_lea.vmem %s19_s8, 256  ;;  %p644_p12 = scmp.lt.s32.totalorder %s19_s8, %s19_s8 }
  0x1b   :  { %p640_p11 = scmp.ne.s32.totalorder %s19_s8, %s639_s16  ;;  %p645_p13 = scmp.lt.s32.totalorder %s639_s16, %s639_s16 }
  0x1d   :  { %p646_p0 = por %p645_p13, %p644_p12 }
  0x1f   :  { %p647_p1 = pnand %p646_p0, %p640_p11 }
  0x21   :  { %650 = shalt.err (!%p647_p1)
}
  0x22   :  { %s705_s1 = smov 64   ;;  %s706_s17 = smov 4  }
  0x23   :  { %24 = dma.hbm_to_vmem [thread:$0]  %s803_s0, 256, %s19_s8, [#allocation3], %s705_s1, %s705_s1, %s706_s17  }
  0x24   :  { %s707_s20 = smov [#allocation7]   ;;  %s651_s24 = scalar_lea.hbm %s806_s3, 2048 }
  0x25   :  { %s44_s21 = sshll.u32 %s707_s20, 4  ;;  %p652_p2 = scmp.ne.s32.totalorder %s806_s3, %s651_s24  ;;  %s45_s21 = int_to_ptr.vmem [resolvable:$true] %s44_s21 }
  0x26   :  { %p655_p3 = scmp.lt.u32.totalorder %s651_s24, %s806_s3 }
  0x28   :  { %p657_p4 = pnand %p655_p3, %p652_p2 }
  0x2a   :  { %660 = shalt.err (!%p657_p4)
}
  0x2b   :  { %s661_s29 = scalar_lea.vmem %s45_s21, 2048  ;;  %p666_p6 = scmp.lt.s32.totalorder %s45_s21, %s45_s21 }
  0x2c   :  { %p662_p5 = scmp.ne.s32.totalorder %s45_s21, %s661_s29  ;;  %p667_p7 = scmp.lt.s32.totalorder %s661_s29, %s661_s29 }
  0x2e   :  { %p668_p8 = por %p667_p7, %p666_p6 }
  0x30   :  { %p669_p9 = pnand %p668_p8, %p662_p5 }
  0x32   :  { %672 = shalt.err (!%p669_p9)
}
  0x33   :  { %50 = dma.hbm_to_vmem [thread:$0]  %s806_s3, 2048, %s45_s21, [#allocation6], %s705_s1, %s705_s1, %s706_s17  }
  0x34   :  { %695 = dma.done.wait [#allocation3], 256  }
  0x35   :  { %696 = vsyncadd [#allocation3], 4294967040 }
  0x36   :  { %697 = dma.done.wait [#allocation6], 4096  }
  0x37   :  { %698 = vsyncadd [#allocation6], 4294963200  ;;  %v708_v0 = vmov 0   ;;  %v565_v1 = vld [vmem:[#allocation5 + $0x4] ss:$8 sps:$4 sm:$0xff]   ;;  %v595_v16 = vld [vmem:[#allocation7 + $0x50] sm:$0xff]   ;;  %v85_v35 = vlaneseq }
  0x38   :  { %219 = vmatprep.mubr.bf16.mxu0 %v708_v0  ;;  %v567_v2 = vld [vmem:[#allocation5] ss:$8 sps:$4 sm:$0xff]   ;;  %187 = vmatprep.subr.bf16.mxu0 %v565_v1  ;;  %v568_v3 = vld [vmem:[#allocation5 + $0x14] ss:$8 sps:$4 sm:$0xff]   ;;  %v570_v4 = vld [vmem:[#allocation5 + $0x10] ss:$8 sps:$4 sm:$0xff]  }
  0x39   :  { %188 = vmatpush1.bf16.msra.mxu0 %v567_v2  ;;  %v571_v5 = vld [vmem:[#allocation5 + $0x24] ss:$8 sps:$4 sm:$0xff]   ;;  %v573_v6 = vld [vmem:[#allocation5 + $0x20] ss:$8 sps:$4 sm:$0xff]   ;;  %v574_v7 = vld [vmem:[#allocation5 + $0x34] ss:$8 sps:$4 sm:$0xff]  }
  0x3a   :  { %189 = vmatprep.subr.bf16.mxu0 %v568_v3  ;;  %v576_v8 = vld [vmem:[#allocation5 + $0x30] ss:$8 sps:$4 sm:$0xff]   ;;  %v577_v9 = vld [vmem:[#allocation5 + $0x44] ss:$8 sps:$4 sm:$0xff]   ;;  %v579_v10 = vld [vmem:[#allocation5 + $0x40] ss:$8 sps:$4 sm:$0xff]  }
  0x3b   :  { %v591_v11 = vld [vmem:[#allocation7 + $0x40] sm:$0xff]   ;;  %v580_v12 = vld [vmem:[#allocation5 + $0x54] ss:$8 sps:$4 sm:$0xff]   ;;  %v593_v14 = vld [vmem:[#allocation7 + $0x48] sm:$0xff]   ;;  %v86_v36 = vshrl.u32 %v85_v35, 7  ;;  %s709_s8 = smov [#allocation8]  }
  0x3c   :  { %v592_v13 = vld [vmem:[#allocation7] sm:$0xff]   ;;  %528 = vmatprep.subr.bf16.mxu1 %v591_v11  ;;  %v594_v15 = vld [vmem:[#allocation7 + $0x8] sm:$0xff]   ;;  %v582_v17 = vld [vmem:[#allocation5 + $0x50] ss:$8 sps:$4 sm:$0xff]   ;;  %s461_s9 = sshll.u32 %s709_s8, 4  ;;  %s462_s9 = int_to_ptr.vmem [resolvable:$true] %s461_s9 }
  0x3d   :  { %190 = vmatpush1.bf16.msra.mxu0 %v570_v4  ;;  %529 = vmatpush3.bf16.msra.mxu1 %v592_v13  ;;  %v583_v18 = vld [vmem:[#allocation5 + $0x64] ss:$8 sps:$4 sm:$0xff]   ;;  %v596_v19 = vld [vmem:[#allocation7 + $0x10] sm:$0xff]   ;;  %v585_v20 = vld [vmem:[#allocation5 + $0x60] ss:$8 sps:$4 sm:$0xff]   ;;  %v87_v37 = vsub.s32 0, %v86_v36  ;;  %p678_p11 = scmp.lt.s32.totalorder %s462_s9, %s462_s9 }
  0x3e   :  { %191 = vmatprep.subr.bf16.mxu0 %v571_v5  ;;  %530 = vmatprep.subr.bf16.mxu1 %v593_v14  ;;  %v597_v21 = vld [vmem:[#allocation7 + $0x58] sm:$0xff]   ;;  %v599_v24 = vld [vmem:[#allocation7 + $0x60] sm:$0xff]   ;;  %v601_v27 = vld [vmem:[#allocation7 + $0x68] sm:$0xff]   ;;  %v91_v39 = vsub.s32 1, %v86_v36 }
  0x3f   :  { %v586_v22 = vld [vmem:[#allocation5 + $0x74] ss:$8 sps:$4 sm:$0xff]   ;;  %v588_v25 = vld [vmem:[#allocation5 + $0x70] ss:$8 sps:$4 sm:$0xff]   ;;  %v600_v26 = vld [vmem:[#allocation7 + $0x20] sm:$0xff]  }
  0x40   :  { %v598_v23 = vld [vmem:[#allocation7 + $0x18] sm:$0xff]   ;;  %v589_v28 = vld [vmem:[#allocation2] sm:$0xff]   ;;  %v602_v30 = vld [vmem:[#allocation7 + $0x28] sm:$0xff]  }
  0x41   :  { %192 = vmatpush1.bf16.msra.mxu0 %v573_v6  ;;  %531 = vmatpush3.bf16.msra.mxu1 %v594_v15  ;;  %v590_v29 = vld [vmem:[#allocation2 + $0x8] sm:$0xff]   ;;  %v603_v31 = vld [vmem:[#allocation7 + $0x70] sm:$0xff]  }
  0x42   :  { %193 = vmatprep.subr.bf16.mxu0 %v574_v7  ;;  %532 = vmatprep.subr.bf16.mxu1 %v595_v16  ;;  %v604_v32 = vld [vmem:[#allocation7 + $0x30] sm:$0xff]   ;;  %v605_v33 = vld [vmem:[#allocation7 + $0x78] sm:$0xff]  }
  0x43   :  { %v606_v34 = vld [vmem:[#allocation7 + $0x38] sm:$0xff]   ;;  %v83_v38 = vld [vmem:[%s805_s2] sm:$0x3] }
  0x44   :  { %v88_v40 = vrot.slane %v83_v38, %v87_v37  ;;  %v92_v41 = vrot.slane %v83_v38, %v91_v39 }
  0x45   :  { %194 = vmatpush1.bf16.msra.mxu0 %v576_v8  ;;  %533 = vmatpush3.bf16.msra.mxu1 %v596_v19 }
  0x46   :  { %195 = vmatprep.subr.bf16.mxu0 %v577_v9  ;;  %534 = vmatprep.subr.bf16.mxu1 %v597_v21 }
  0x49   :  { %196 = vmatpush1.bf16.msra.mxu0 %v579_v10  ;;  %535 = vmatpush3.bf16.msra.mxu1 %v598_v23  ;;  %v492_v10 = vld [vmem:[%s807_s4] ss:$0 sm:$0xff]  ;;  %s673_s4 = scalar_lea.vmem %s462_s9, 256 }
  0x4a   :  { %197 = vmatprep.subr.bf16.mxu0 %v580_v12  ;;  %536 = vmatprep.subr.bf16.mxu1 %v599_v24  ;;  %p674_p10 = scmp.ne.s32.totalorder %s462_s9, %s673_s4  ;;  %p679_p12 = scmp.lt.s32.totalorder %s673_s4, %s673_s4 }
  0x4c   :  { %p680_p13 = por %p679_p12, %p678_p11 }
  0x4d   :  { %198 = vmatpush1.bf16.msra.mxu0 %v582_v17  ;;  %537 = vmatpush3.bf16.msra.mxu1 %v600_v26 }
  0x4e   :  { %199 = vmatprep.subr.bf16.mxu0 %v583_v18  ;;  %538 = vmatprep.subr.bf16.mxu1 %v601_v27  ;;  %p681_p0 = pnand %p680_p13, %p674_p10 }
  0x51   :  { %200 = vmatpush1.bf16.msra.mxu0 %v585_v20  ;;  %539 = vmatpush3.bf16.msra.mxu1 %v602_v30 }
  0x52   :  { %201 = vmatprep.subr.bf16.mxu0 %v586_v22  ;;  %540 = vmatprep.subr.bf16.mxu1 %v603_v31 }
  0x55   :  { %202 = vmatpush1.bf16.msra.mxu0 %v588_v25  ;;  %541 = vmatpush3.bf16.msra.mxu1 %v604_v32 }
  0x56   :  { %542 = vmatprep.subr.bf16.mxu1 %v605_v33 }
  0x58   :  { %220 = vmatmul.mubr.bf16.vlgmr.msra.gmra.mrb[0].mxu0 %v589_v28 }
  0x59   :  { %229 = vmatprep.mubr.bf16.mxu0 %v708_v0  ;;  %543 = vmatpush3.bf16.msra.mxu1 %v606_v34 }
  0x60   :  { %230 = vmatmul.mubr.bf16.gmra.mrb[4].mxu0 %v590_v29 }
 0x12b   :  { %v221_v42 = vpop.f32.mrb[0].mxu0 }
 0x12c   :  { %v222_v43 = vadd.f32 %v221_v42, %v88_v40  ;;  %v223_v44 = vpop.f32.mrb[1].mxu0 }
 0x12d   :  { %v224_v45 = vadd.f32 %v223_v44, %v92_v41  ;;  %v225_v46 = vpop.f32.mrb[2].mxu0 }
 0x12e   :  { %v226_v47 = vadd.f32 %v225_v46, %v88_v40  ;;  %v227_v48 = vpop.f32.mrb[3].mxu0  ;;  %v240_v50 = vmax.f32 %v222_v43, 0.0 }
 0x12f   :  { %v228_v49 = vadd.f32 %v227_v48, %v92_v41  ;;  %v241_v52 = vmax.f32 %v224_v45, 0.0 }
 0x130   :  { %v242_v51 = vmax.f32 %v226_v47, 0.0 }
 0x131   :  { %v243_v53 = vmax.f32 %v228_v49, 0.0 }
 0x132   :  { %v248_v54 = vpack.c.bf16 %v242_v51, %v240_v50 }
 0x133   :  { %v231_v55 = vpop.f32.mrb[4].mxu0  ;;  %v249_v56 = vpack.c.bf16 %v243_v53, %v241_v52 }
 0x134   :  { %v232_v57 = vadd.f32 %v231_v55, %v88_v40  ;;  %v233_v58 = vpop.f32.mrb[5].mxu0 }
 0x135   :  { %v234_v59 = vadd.f32 %v233_v58, %v92_v41  ;;  %v235_v60 = vpop.f32.mrb[6].mxu0  ;;  %419 = vmatprep.mubr.bf16.mxu1 %v249_v56 }
 0x136   :  { %v236_v61 = vadd.f32 %v235_v60, %v88_v40  ;;  %v237_v62 = vpop.f32.mrb[7].mxu0  ;;  %420 = vmatmul.mubr.bf16.vlgmr.msra.gmra.mrb[0].mxu1 %v248_v54  ;;  %v244_v0 = vmax.f32 %v232_v57, 0.0 }
 0x137   :  { %v238_v63 = vadd.f32 %v237_v62, %v92_v41  ;;  %v245_v2 = vmax.f32 %v234_v59, 0.0 }
 0x138   :  { %v246_v1 = vmax.f32 %v236_v61, 0.0 }
 0x139   :  { %v247_v3 = vmax.f32 %v238_v63, 0.0 }
 0x13a   :  { %v250_v4 = vpack.c.bf16 %v246_v1, %v244_v0 }
 0x13b   :  { %v251_v5 = vpack.c.bf16 %v247_v3, %v245_v2 }
 0x13d   :  { %427 = vmatprep.mubr.bf16.mxu1 %v251_v5 }
 0x13e   :  { %428 = vmatmul.mubr.bf16.gmra.mrb[4].mxu1 %v250_v4 }
 0x209   :  { %v544_v6 = vpop.f32.mrb[0].mxu1 }
 0x20a   :  { %v545_v7 = vpop.f32.mrb[1].mxu1 }
 0x20b   :  { %v546_v8 = vadd.f32 %v545_v7, %v544_v6  ;;  %v547_v9 = vpop.f32.mrb[2].mxu1 }
 0x20c   :  { %v548_v11 = vpop.f32.mrb[3].mxu1 }
 0x20d   :  { %v549_v12 = vadd.f32 %v548_v11, %v547_v9  ;;  %v422_v13 = vadd.f32 %v546_v8, %v492_v10 }
 0x20f   :  { %v425_v14 = vadd.f32 %v549_v12, %v492_v10 }
 0x211   :  { %v520_v15 = vpack.c.bf16 %v425_v14, %v422_v13  ;;  %v550_v16 = vpop.f32.mrb[4].mxu1 }
 0x212   :  { %v551_v17 = vpop.f32.mrb[5].mxu1 }
 0x213   :  { %521 = vst [vmem:[#allocation8] sm:$0xff] %v520_v15   ;;  %v552_v18 = vadd.f32 %v551_v17, %v550_v16  ;;  %v553_v19 = vpop.f32.mrb[6].mxu1 }
 0x214   :  { %v554_v20 = vpop.f32.mrb[7].mxu1 }
 0x215   :  { %v555_v21 = vadd.f32 %v554_v20, %v553_v19  ;;  %v430_v22 = vadd.f32 %v552_v18, %v492_v10 }
 0x217   :  { %v433_v23 = vadd.f32 %v555_v21, %v492_v10 }
 0x219   :  { %v525_v24 = vpack.c.bf16 %v433_v23, %v430_v22 }
 0x21b   :  { %527 = vst [vmem:[#allocation8 + $0x8] sm:$0xff] %v525_v24  }
 0x21c   :  { %684 = shalt.err (!%p681_p0)
}
 0x21d   :  { %s685_s12 = scalar_lea.hbm %s808_s5, 256 }
 0x21e   :  { %p686_p1 = scmp.ne.s32.totalorder %s808_s5, %s685_s12  ;;  %p689_p2 = scmp.lt.u32.totalorder %s685_s12, %s808_s5 }
 0x220   :  { %p691_p3 = pnand %p689_p2, %p686_p1 }
 0x222   :  { %694 = shalt.err (!%p691_p3)
}
 0x223   :  { %467 = dma.vmem_to_hbm [thread:$0]  %s462_s9, 256, %s808_s5, [#allocation4], %s705_s1, %s705_s1, %s706_s17  }
 0x224   :  { %699 = dma.done.wait [#allocation4], 256  }
 0x225   :  { %700 = vsyncadd [#allocation4], 4294967040 }
 0x226   :  { %471 = vsyncpa [#allocation3], 1 }
 0x227   :  { %472 = vsyncpa [#allocation6], 1 }
 0x228   :  { %473 = vsyncpa [#allocation4], 1 }

</bundles_post_ra>
